<compile_context>
chip_gen: v7x
topology: tpu7x:2x2x1
jax: 0.10.0
libtpu: 0.0.40
codegen_flags: <defaults>
</compile_context>

<pallas_src>
import jax
import jax.numpy as jnp
from jax.experimental import pallas as pl
from jax.experimental.pallas import tpu as pltpu
from jax.scipy.special import erf as _jax_erf

_SQRT_HALF = 0.7071067811865476          # 1/sqrt(2)
_AS_P_SCALED = 0.3275911 * _SQRT_HALF    # A&S p, pre-scaled by 1/sqrt(2)
# A&S 7.1.26 coefficients pre-multiplied by 0.5 (folds the CDF's 0.5).
_B1 = 0.5 * 0.254829592
_B2 = 0.5 * -0.284496736
_B3 = 0.5 * 1.421413741
_B4 = 0.5 * -1.453152027
_B5 = 0.5 * 1.061405429


def _gelu_xai_kernel(x_ref, o_ref):
    """One row tile: y = x * gelu(x)/(x+1e-6) = x^2 * Phi(x) / (x + 1e-6)."""
    x = x_ref[...].astype(jnp.float32)
    xx = x * x
    # Phi(x) = 0.5*(1 + erf(x/sqrt2)) via A&S 7.1.26 with 0.5 folded into the
    # polynomial and the sign select folded into the CDF:
    #   t   = 1 / (1 + p*|x|/sqrt2)
    #   q   = 0.5*poly(t)*exp(-x^2/2)
    #   Phi = q (x<0),  1-q (x>=0)
    t = 1.0 / (1.0 + _AS_P_SCALED * jnp.abs(x))
    q = (((((_B5 * t + _B4) * t + _B3) * t + _B2) * t + _B1) * t
         * jnp.exp(-0.5 * xx))
    phi = jnp.where(x < 0.0, q, 1.0 - q)
    o_ref[...] = (xx * phi / (x + 1e-6)).astype(o_ref.dtype)


def _forward_jax(x):
    """Exact-erf fallback / reference for tiny tails (plain JAX, elementwise)."""
    xf = x.astype(jnp.float32)
    g = 0.5 * xf * (1.0 + _jax_erf(xf * _SQRT_HALF))
    return (xf * (g / (xf + 1e-6))).astype(x.dtype)


def _choose_width(total):
    """Pick a lane-dense row width. Returns (W, exact) where exact means W | total."""
    for w in (2048, 1024, 512, 256, 128):
        if total % w == 0:
            return w, True
    # Odd total: prefix/tail split. Prefer a wide W as long as the aligned
    # prefix still has a healthy number of rows; otherwise minimize the tail.
    for w in (2048, 1024, 512, 256):
        if total >= 64 * w:
            return w, False
    return 128, False


def _pick_block_rows(n_rows, W, itemsize, vmem_budget):
    """Tile sized by bytes, kept pipelined, never exceeding the VMEM budget."""
    row_bytes = W * itemsize
    # ~4 MiB per buffer target; 2x(in+out) double-buffered tiles must stay
    # within ~2/3 of the scoped VMEM budget (headroom for pipeline bookkeeping).
    tile_bytes = min(4 * 1024 * 1024, (vmem_budget * 2 // 3) // 4)
    block_rows = max(8, tile_bytes // row_bytes)
    block_rows -= block_rows % 8
    block_rows = max(8, block_rows)
    # Keep >= ~8 pipelined grid steps when the array is large enough so DMA and
    # compute overlap (never collapse mid-size activations to grid=(1,)).
    min_steps = 8
    if n_rows >= min_steps * 8:
        cap = max(8, ((n_rows // min_steps) // 8) * 8)
        block_rows = min(block_rows, cap)
    if block_rows > n_rows:
        block_rows = n_rows  # tiny input: single block equal to the full dim
    return int(block_rows)


def gelu_xai(x, *, interpret=False):
    """JAX wrapper reproducing GELUActivationXAI.forward (forward values)."""
    orig_shape = x.shape
    dtype = x.dtype
    total = x.size
    if total == 0:
        return x

    flat = x.reshape(-1)
    W, exact = _choose_width(total)
    prefix = total if exact else (total // W) * W
    if prefix == 0:
        # Fewer than W elements: a kernel launch isn't worth it.
        return _forward_jax(x)

    n_rows = prefix // W
    x2 = (flat if exact else flat[:prefix]).reshape(n_rows, W)

    itemsize = jnp.dtype(dtype).itemsize
    try:
        vmem_cap = pltpu.get_tpu_info().vmem_capacity_bytes
    except Exception:
        vmem_cap = 128 * 1024 * 1024
    # Scoped budget: half of physical VMEM, capped at 64 MiB
    # (v5e/v6e -> 64 MiB, v7x (64 MiB physical) -> 32 MiB).
    vmem_budget = int(min(vmem_cap // 2, 64 * 1024 * 1024))

    block_rows = _pick_block_rows(n_rows, W, itemsize, vmem_budget)
    grid = (pl.cdiv(n_rows, block_rows),)  # ragged last block is safe: elementwise

    cost = pl.CostEstimate(
        flops=20 * prefix,
        transcendentals=prefix,
        bytes_accessed=2 * prefix * itemsize,
    )

    out2 = pl.pallas_call(
        _gelu_xai_kernel,
        out_shape=jax.ShapeDtypeStruct((n_rows, W), dtype),
        grid=grid,
        in_specs=[pl.BlockSpec((block_rows, W), lambda i: (i, 0))],
        out_specs=pl.BlockSpec((block_rows, W), lambda i: (i, 0)),
        compiler_params=pltpu.CompilerParams(
            dimension_semantics=("parallel",),
            vmem_limit_bytes=vmem_budget,
        ),
        cost_estimate=cost,
        interpret=interpret,
    )(x2)

    out_flat = out2.reshape(-1)
    if prefix != total:
        # Tiny (< W element) tail handled in plain JAX; no full-array pad/slice.
        tail = _forward_jax(flat[prefix:])
        out_flat = jnp.concatenate([out_flat, tail])
    return out_flat.reshape(orig_shape)


if __name__ == "__main__":
    # Shape implied by a transformer activation: (batch=2, seq=8, hidden=32).
    key = jax.random.PRNGKey(0)
    x = jax.random.normal(key, (2, 8, 32), dtype=jnp.float32)

    out = jax.block_until_ready(gelu_xai(x))
    ref = _forward_jax(x)
    ok = bool(jnp.allclose(out, ref, atol=1e-5, rtol=1e-5))
    if not ok:
        print("main shape max err:", float(jnp.max(jnp.abs(out - ref))))

    # Odd-sized input exercises the aligned-prefix + plain-JAX-tail path.
    x_odd = jax.random.normal(jax.random.PRNGKey(1), (3, 7, 33), dtype=jnp.float32)
    out_odd = jax.block_until_ready(gelu_xai(x_odd))
    ref_odd = _forward_jax(x_odd)
    ok_odd = bool(jnp.allclose(out_odd, ref_odd, atol=1e-5, rtol=1e-5))
    if not ok_odd:
        print("odd shape max err:", float(jnp.max(jnp.abs(out_odd - ref_odd))))

    if ok and ok_odd:
        print("KERNEL_OK")
</pallas_src>

<mosaic_0001>
module attributes {stable_mosaic.version = 11 : i64} {
  func.func @_gelu_xai_kernel(%arg0: i32, %arg1: memref<1x512xf32, #tpu.memory_space<vmem>>, %arg2: memref<1x512xf32, #tpu.memory_space<vmem>>) attributes {dimension_semantics = [#tpu.dimension_semantics<parallel>], iteration_bounds = array<i64: 1>, scalar_prefetch = 0 : i64, scratch_operands = 0 : i64, tpu.core_type = #tpu.core_type<tc>, window_params = [{transform_indices = @transform_0, window_bounds = array<i64: 1, 512>}, {transform_indices = @transform_1, window_bounds = array<i64: 1, 512>}]} {
    %c0 = arith.constant 0 : index
    %c0_0 = arith.constant 0 : index
    %0 = vector.load %arg1[%c0, %c0_0] : memref<1x512xf32, #tpu.memory_space<vmem>>, vector<1x512xf32>
    %1 = arith.mulf %0, %0 : vector<1x512xf32>
    %2 = math.absf %0 : vector<1x512xf32>
    %cst = arith.constant 0.231641889 : f32
    %3 = vector.broadcast %cst : f32 to vector<1x512xf32>
    %4 = arith.mulf %3, %2 : vector<1x512xf32>
    %cst_1 = arith.constant 1.000000e+00 : f32
    %5 = vector.broadcast %cst_1 : f32 to vector<1x512xf32>
    %6 = arith.addf %5, %4 : vector<1x512xf32>
    %cst_2 = arith.constant 1.000000e+00 : f32
    %7 = vector.broadcast %cst_2 : f32 to vector<1x512xf32>
    %8 = arith.divf %7, %6 : vector<1x512xf32>
    %cst_3 = arith.constant 0.53070271 : f32
    %9 = vector.broadcast %cst_3 : f32 to vector<1x512xf32>
    %10 = arith.mulf %9, %8 : vector<1x512xf32>
    %cst_4 = arith.constant -0.72657603 : f32
    %11 = vector.broadcast %cst_4 : f32 to vector<1x512xf32>
    %12 = arith.addf %10, %11 : vector<1x512xf32>
    %13 = arith.mulf %12, %8 : vector<1x512xf32>
    %cst_5 = arith.constant 0.710706889 : f32
    %14 = vector.broadcast %cst_5 : f32 to vector<1x512xf32>
    %15 = arith.addf %13, %14 : vector<1x512xf32>
    %16 = arith.mulf %15, %8 : vector<1x512xf32>
    %cst_6 = arith.constant -0.142248362 : f32
    %17 = vector.broadcast %cst_6 : f32 to vector<1x512xf32>
    %18 = arith.addf %16, %17 : vector<1x512xf32>
    %19 = arith.mulf %18, %8 : vector<1x512xf32>
    %cst_7 = arith.constant 0.127414793 : f32
    %20 = vector.broadcast %cst_7 : f32 to vector<1x512xf32>
    %21 = arith.addf %19, %20 : vector<1x512xf32>
    %22 = arith.mulf %21, %8 : vector<1x512xf32>
    %cst_8 = arith.constant -5.000000e-01 : f32
    %23 = vector.broadcast %cst_8 : f32 to vector<1x512xf32>
    %24 = arith.mulf %23, %1 : vector<1x512xf32>
    %25 = math.exp %24 : vector<1x512xf32>
    %26 = arith.mulf %22, %25 : vector<1x512xf32>
    %cst_9 = arith.constant 0.000000e+00 : f32
    %27 = vector.broadcast %cst_9 : f32 to vector<1x512xf32>
    %28 = arith.cmpf olt, %0, %27 : vector<1x512xf32>
    %cst_10 = arith.constant 1.000000e+00 : f32
    %29 = vector.broadcast %cst_10 : f32 to vector<1x512xf32>
    %30 = arith.subf %29, %26 : vector<1x512xf32>
    %31 = arith.select %28, %26, %30 : vector<1x512xi1>, vector<1x512xf32>
    %32 = arith.mulf %1, %31 : vector<1x512xf32>
    %cst_11 = arith.constant 9.99999997E-7 : f32
    %33 = vector.broadcast %cst_11 : f32 to vector<1x512xf32>
    %34 = arith.addf %0, %33 : vector<1x512xf32>
    %35 = arith.divf %32, %34 : vector<1x512xf32>
    %c0_12 = arith.constant 0 : index
    %c0_13 = arith.constant 0 : index
    %36 = vector.load %arg2[%c0_12, %c0_13] : memref<1x512xf32, #tpu.memory_space<vmem>>, vector<1x512xf32>
    tpu.vector_store %arg2[%c0_12, %c0_13], %35 {strides = array<i32>} : memref<1x512xf32, #tpu.memory_space<vmem>>, vector<1x512xf32>,
    return
  }
  func.func @transform_0(%arg0: i32) -> (i32, i32) {
    %c0_i32 = arith.constant 0 : i32
    %c0_i32_0 = arith.constant 0 : i32
    return %arg0, %c0_i32 : i32, i32
  }
  func.func @transform_1(%arg0: i32) -> (i32, i32) {
    %c0_i32 = arith.constant 0 : i32
    %c0_i32_0 = arith.constant 0 : i32
    return %arg0, %c0_i32 : i32, i32
  }
}

</mosaic_0001>

<bundles_post_ra>
// kernel: tpu_custom_call.1
= control target key start
LH: loop header
LB: loop body
LE: loop exit
PB: predicated region body
PF: predicated region fallthrough
CT: control target
= control target key end

     0   :  { %6 = vsyncpa [#allocation3], 0  ;;  %s160_s0 = inlined_call_operand.hbm [shape: f32[1,512], index: 0, kind: input, shape index: {}]   ;;  %s161_s1 = inlined_call_operand.hbm [shape: f32[1,512], index: 1, kind: output, shape index: {}]  }
   0x1   :  { %7 = vsyncpa [#allocation4], 0  ;;  %s124_s6 = smov [#allocation2]   ;;  %s76_s10 = scalar_lea.hbm %s160_s0, 64 }
   0x2   :  { %s14_s7 = sshll.u32 %s124_s6, 4  ;;  %p77_p0 = scmp.ne.s32.totalorder %s160_s0, %s76_s10  ;;  %s15_s7 = int_to_ptr.vmem [resolvable:$true] %s14_s7 }
   0x3   :  { %p80_p1 = scmp.lt.u32.totalorder %s76_s10, %s160_s0 }
   0x5   :  { %p82_p2 = pnand %p80_p1, %p77_p0 }
   0x7   :  { %85 = shalt.err (!%p82_p2)
}
   0x8   :  { %s86_s15 = scalar_lea.vmem %s15_s7, 64  ;;  %p91_p4 = scmp.lt.s32.totalorder %s15_s7, %s15_s7 }
   0x9   :  { %p87_p3 = scmp.ne.s32.totalorder %s15_s7, %s86_s15  ;;  %p92_p5 = scmp.lt.s32.totalorder %s86_s15, %s86_s15 }
   0xb   :  { %p93_p6 = por %p92_p5, %p91_p4 }
   0xd   :  { %p94_p7 = pnand %p93_p6, %p87_p3 }
   0xf   :  { %97 = shalt.err (!%p94_p7)
}
  0x10   :  { %17 = dma.hbm_to_vmem [thread:$0]  %s160_s0, 64, %s15_s7, [#allocation3]  }
  0x11   :  { %120 = dma.done.wait [#allocation3], 64  }
  0x12   :  { %121 = vsyncadd [#allocation3], 4294967232  ;;  %v21_v0 = vld [vmem:[#allocation2] sm:$0xf]  ;;  %v48_v21 = vlaneseq  ;;  %s125_s0 = smov [#allocation5]  }
  0x13   :  { %v23_v1 = vand.u32 2147483647, %v21_v0  ;;  %v22_v4 = vmul.f32 %v21_v0, %v21_v0  ;;  %v45_v13 = vadd.f32 1e-06, %v21_v0  ;;  %vm41_vm0 = vcmp.lt.f32.partialorder %v21_v0, 0.0  ;;  %s59_s18 = sshll.u32 %s125_s0, 4  ;;  %s60_s18 = int_to_ptr.vmem [resolvable:$true] %s59_s18 }
  0x14   :  { %vm50_vm1 = vcmp.lt.s32.totalorder %v48_v21, 512  ;;  %s98_s19 = scalar_lea.vmem %s60_s18, 64  ;;  %p103_p9 = scmp.lt.s32.totalorder %s60_s18, %s60_s18 }
  0x15   :  { %v24_v2 = vmul.f32 0.23164189, %v23_v1  ;;  %v37_v5 = vmul.f32 -0.5, %v22_v4  ;;  %p99_p8 = scmp.ne.s32.totalorder %s60_s18, %s98_s19  ;;  %p104_p10 = scmp.lt.s32.totalorder %s98_s19, %s98_s19 }
  0x17   :  { %v25_v3 = vadd.f32 1.0, %v24_v2  ;;  %v38_v8 = vmul.f32 1.442695, %v37_v5  ;;  %p105_p11 = por %p104_p10, %p103_p9 }
  0x19   :  { %70 = vrcp.f32 %v25_v3  ;;  %p106_p12 = pnand %p105_p11, %p99_p8 }
  0x1a   :  { %72 = vpow2.f32 %v38_v8 }
  0x1b   :  { %74 = vrcp.f32 %v45_v13 }
  0x23   :  { %v71_v6 = vpop.eup %70 }
  0x24   :  { %v28_v7 = vmul.f32 0.5307027, %v71_v6  ;;  %v73_v17 = vpop.eup %72 }
  0x25   :  { %v75_v22 = vpop.eup %74 }
  0x26   :  { %v29_v9 = vadd.f32 -0.72657603, %v28_v7 }
  0x28   :  { %v30_v10 = vmul.f32 %v71_v6, %v29_v9 }
  0x2a   :  { %v31_v11 = vadd.f32 0.7107069, %v30_v10 }
  0x2c   :  { %v32_v12 = vmul.f32 %v71_v6, %v31_v11 }
  0x2e   :  { %v33_v14 = vadd.f32 -0.14224836, %v32_v12 }
  0x30   :  { %v34_v15 = vmul.f32 %v71_v6, %v33_v14 }
  0x32   :  { %v35_v16 = vadd.f32 0.1274148, %v34_v15 }
  0x34   :  { %v36_v18 = vmul.f32 %v71_v6, %v35_v16 }
  0x36   :  { %v40_v19 = vmul.f32 %v73_v17, %v36_v18 }
  0x38   :  { %v42_v20 = vsub.f32 1.0, %v40_v19 }
  0x3a   :  { %v43_v23 = vsel %vm41_vm0, %v40_v19, %v42_v20 }
  0x3b   :  { %v44_v24 = vmul.f32 %v43_v23, %v22_v4 }
  0x3d   :  { %v47_v25 = vmul.f32 %v75_v22, %v44_v24 }
  0x3f   :  { %52 = vst.msk [vmem:[#allocation5] sm:$0xf] %vm50_vm1, %v47_v25 }
  0x40   :  { %109 = shalt.err (!%p106_p12)
}
  0x41   :  { %s110_s22 = scalar_lea.hbm %s161_s1, 64 }
  0x42   :  { %p111_p13 = scmp.ne.s32.totalorder %s161_s1, %s110_s22  ;;  %p114_p0 = scmp.lt.u32.totalorder %s110_s22, %s161_s1 }
  0x44   :  { %p116_p1 = pnand %p114_p0, %p111_p13 }
  0x46   :  { %119 = shalt.err (!%p116_p1)
}
  0x47   :  { %62 = dma.vmem_to_hbm [thread:$0]  %s60_s18, 64, %s161_s1, [#allocation4]  }
  0x48   :  { %122 = dma.done.wait [#allocation4], 64  }
  0x49   :  { %123 = vsyncadd [#allocation4], 4294967232 }
  0x4a   :  { %66 = vsyncpa [#allocation3], 1 }
  0x4b   :  { %67 = vsyncpa [#allocation4], 1 }

</bundles_post_ra>
